<compile_context>
chip_gen: v5e
topology: v5e:2x2
jax: 0.10.0
libtpu: 0.0.40
codegen_flags: <defaults>
</compile_context>

<pallas_src>
import jax
import jax.numpy as jnp
from jax.experimental import pallas as pl
from jax.experimental.pallas import tpu as pltpu


_TILE_ROWS_MAX = 4096                    # rows per grid step (multiple of 8); also bounds
                                         # the 128-lane-padded (TB, 1) output VMEM buffer.
_X_TILE_BYTES_BUDGET = 8 * 1024 * 1024   # per X tile buffer (x2 for double buffering)
_VMEM_LIMIT_BYTES = 32 * 1024 * 1024     # fits scoped VMEM on v5e/v6e/v7x (per TC)


def _round_up(x, m):
    return ((x + m - 1) // m) * m


def _linear_kernel(x_ref, w_ref, b_ref, o_ref):
    # x_ref: (TB, F) f32 VMEM; w_ref: (F, 1) f32 VMEM; b_ref: (1, 1) f32 SMEM;
    # o_ref: (TB, 1) f32 VMEM.
    # Single MXU dot per tile; accumulation in f32 via preferred_element_type.
    acc = jnp.dot(x_ref[...], w_ref[...], preferred_element_type=jnp.float32)
    o_ref[...] = (acc + b_ref[0, 0]).astype(o_ref.dtype)


def linear_forward(x, w_row, b, *, tile_batch=None):
    """y = x @ w_row.T + b via a Pallas TPU kernel.

    x:     (N, F) float32
    w_row: (1, F) float32   (nn.Linear weight layout)
    b:     (1,)   float32
    returns (N, 1) float32
    """
    n, f = x.shape
    assert w_row.shape == (1, f)
    x = x.astype(jnp.float32)
    w_col = w_row.reshape(f, 1).astype(jnp.float32)   # MXU-friendly column layout
    b2 = b.reshape(1, 1).astype(jnp.float32)

    if tile_batch is None:
        # Rows per step so one X tile stays within the byte budget (double
        # buffered), capped by _TILE_ROWS_MAX (bounds the lane-padded output
        # buffer) and by what the batch actually needs.
        rows_by_vmem = max(8, (_X_TILE_BYTES_BUDGET // (f * 4)) // 8 * 8)
        tile_batch = min(_TILE_ROWS_MAX, rows_by_vmem, _round_up(n, 8))
    tile_batch = max(8, _round_up(tile_batch, 8))
    # NOTE: for extremely large F a single 8-row tile can exceed the budget;
    # vmem_limit_bytes gives headroom, and correctness is unaffected.

    # Ragged tail handled by Pallas: partial last block is clipped on read and
    # masked on write, so no wrapper-side jnp.pad (no extra HBM traffic).
    grid = (pl.cdiv(n, tile_batch),)

    out = pl.pallas_call(
        _linear_kernel,
        out_shape=jax.ShapeDtypeStruct((n, 1), jnp.float32),
        grid_spec=pl.GridSpec(
            grid=grid,
            in_specs=[
                pl.BlockSpec((tile_batch, f), lambda i: (i, 0)),        # X row tile
                pl.BlockSpec((f, 1), lambda i: (0, 0)),                 # W column (replicated)
                pl.BlockSpec(memory_space=pltpu.MemorySpace.SMEM),      # bias scalar
            ],
            out_specs=pl.BlockSpec((tile_batch, 1), lambda i: (i, 0)),
        ),
        compiler_params=pltpu.CompilerParams(
            # "parallel" shards row blocks across v7x's two TensorCores; it is
            # a no-op (within noise) on single-TC v5e/v6e.
            dimension_semantics=("parallel",),
            vmem_limit_bytes=_VMEM_LIMIT_BYTES,
        ),
    )(x, w_col, b2)

    return out


class PallasHousePriceModule:
    """Mirror of d2l `Module` with net = LazyLinear(1), forward on TPU via Pallas."""

    def __init__(self, num_features, key):
        kw, _ = jax.random.split(key)
        # Deterministic synthetic init (analogous to nn.Linear's default init);
        # weight kept in the PyTorch (out_features=1, in_features=F) layout.
        self.w = jax.random.normal(kw, (1, num_features), jnp.float32) * 0.01
        self.b = jnp.zeros((1,), jnp.float32)

    def forward(self, x):
        # NOTE: for tiny batches the pallas_call fixed cost dominates; the
        # Pallas path pays off once N*F*4 bytes is in the multi-MB range.
        return linear_forward(x, self.w, self.b)


if __name__ == "__main__":
    key = jax.random.PRNGKey(0)
    k_x, k_p = jax.random.split(key)

    # Small shapes consistent with the module's forward (X: (batch, features)).
    batch, num_features = 8, 32
    x = jax.random.normal(k_x, (batch, num_features), jnp.float32)

    model = PallasHousePriceModule(num_features, k_p)
    y = model.forward(x)
    y = jax.block_until_ready(y)

    # Cross-check against plain-JAX reference of the same affine map.
    y_ref = x @ model.w.T + model.b.reshape(1, 1)
    assert y.shape == (batch, 1)
    assert jnp.allclose(y, y_ref, atol=1e-5), "mismatch vs reference"

    # Exercise the multi-step grid with a ragged tail (no wrapper pad): batch
    # not a multiple of the tile, nor of 8, and a house-price-like feature
    # count that isn't a multiple of 128.
    f2 = 200
    k_x2, k_p2 = jax.random.split(jax.random.fold_in(key, 1))
    x2 = jax.random.normal(k_x2, (1003, f2), jnp.float32)
    w2 = jax.random.normal(k_p2, (1, f2), jnp.float32) * 0.01
    b2 = jnp.float32(0.5) * jnp.ones((1,), jnp.float32)
    y2 = jax.block_until_ready(linear_forward(x2, w2, b2, tile_batch=256))
    y2_ref = x2 @ w2.T + b2.reshape(1, 1)
    assert y2.shape == (1003, 1)
    assert jnp.allclose(y2, y2_ref, atol=1e-4), "mismatch vs reference (tiled/ragged path)"

    print("KERNEL_OK")
</pallas_src>

<mosaic_0001>
module attributes {stable_mosaic.version = 11 : i64} {
  func.func @_linear_kernel(%arg0: i32, %arg1: memref<8x32xf32, #tpu.memory_space<vmem>>, %arg2: memref<32x1xf32, #tpu.memory_space<vmem>>, %arg3: memref<1x1xf32, #tpu.memory_space<smem>>, %arg4: memref<8x1xf32, #tpu.memory_space<vmem>>) attributes {dimension_semantics = [#tpu.dimension_semantics<parallel>], iteration_bounds = array<i64: 1>, scalar_prefetch = 0 : i64, scratch_operands = 0 : i64, tpu.core_type = #tpu.core_type<tc>, window_params = [{transform_indices = @transform_0, window_bounds = array<i64: 8, 32>}, {pipeline_mode = #tpu.pipeline_mode<synchronous>, transform_indices = @transform_1, window_bounds = array<i64: 32, 1>}, {transform_indices = @transform_2, window_bounds = array<i64: 1, 1>}, {transform_indices = @transform_3, window_bounds = array<i64: 8, 1>}]} {
    %c0 = arith.constant 0 : index
    %c0_0 = arith.constant 0 : index
    %0 = vector.load %arg1[%c0, %c0_0] : memref<8x32xf32, #tpu.memory_space<vmem>>, vector<8x32xf32>
    %c0_1 = arith.constant 0 : index
    %c0_2 = arith.constant 0 : index
    %1 = vector.load %arg2[%c0_1, %c0_2] : memref<32x1xf32, #tpu.memory_space<vmem>>, vector<32x1xf32>
    %cst = arith.constant dense<0.000000e+00> : vector<8x1xf32>
    %2 = tpu.matmul %0, %1, %cst {dimension_numbers = #tpu.dot_dimension_numbers<[1], [0], [0], [1], [0, 0, 1, 1], [], []>} : vector<8x32xf32>, vector<32x1xf32>, vector<8x1xf32> -> vector<8x1xf32>
    %c0_3 = arith.constant 0 : index
    %c0_4 = arith.constant 0 : index
    %3 = memref.load %arg3[%c0_3, %c0_4] : memref<1x1xf32, #tpu.memory_space<smem>>
    %4 = vector.broadcast %3 : f32 to vector<8x1xf32>
    %5 = arith.addf %2, %4 : vector<8x1xf32>
    %c0_5 = arith.constant 0 : index
    %c0_6 = arith.constant 0 : index
    %6 = vector.load %arg4[%c0_5, %c0_6] : memref<8x1xf32, #tpu.memory_space<vmem>>, vector<8x1xf32>
    tpu.vector_store %arg4[%c0_5, %c0_6], %5 {strides = array<i32>} : memref<8x1xf32, #tpu.memory_space<vmem>>, vector<8x1xf32>,
    return
  }
  func.func @transform_0(%arg0: i32) -> (i32, i32) {
    %c0_i32 = arith.constant 0 : i32
    %c0_i32_0 = arith.constant 0 : i32
    return %arg0, %c0_i32 : i32, i32
  }
  func.func @transform_1(%arg0: i32) -> (i32, i32) {
    %c0_i32 = arith.constant 0 : i32
    %c0_i32_0 = arith.constant 0 : i32
    %c0_i32_1 = arith.constant 0 : i32
    return %c0_i32, %c0_i32_0 : i32, i32
  }
  func.func @transform_2(%arg0: i32) -> (i32, i32) {
    %c0_i32 = arith.constant 0 : i32
    %c0_i32_0 = arith.constant 0 : i32
    %c0_i32_1 = arith.constant 0 : i32
    return %c0_i32, %c0_i32_0 : i32, i32
  }
  func.func @transform_3(%arg0: i32) -> (i32, i32) {
    %c0_i32 = arith.constant 0 : i32
    %c0_i32_0 = arith.constant 0 : i32
    return %arg0, %c0_i32 : i32, i32
  }
}

</mosaic_0001>

<bundles_post_ra>
// kernel: tpu_custom_call.1
= control target key start
LH: loop header
LB: loop body
LE: loop exit
PB: predicated region body
PF: predicated region fallthrough
CT: control target
= control target key end

     0   :  { %vm22_vm0 = vcmask 261120   ;;  %vm46_vm1 = vcmask 7168   ;;  %s94_s1 = inlined_call_operand.vmem [shape: f32[32,1], index: 1, kind: input, shape index: {}]   ;;  %s95_s0 = inlined_call_operand.vmem [shape: f32[8,32], index: 0, kind: input, shape index: {}]   ;;  %s96_s2 = inlined_call_operand.<no memory space> [shape: f32[1,1], index: 2, kind: input, shape index: {}]   ;;  %s97_s3 = inlined_call_operand.vmem [shape: f32[8,1], index: 3, kind: output, shape index: {}]  }
   0x1   :  { %v19_v0 = vld [vmem:[%s94_s1 + $0x18] sm:$0xff]  ;;  %v18_v1 = vld [vmem:[%s94_s1 + $0x10] sm:$0xff]  ;;  %v17_v2 = vld [vmem:[%s94_s1 + $0x8] sm:$0xff]  ;;  %v21_v5 = vstv %s96_s2 }
   0x2   :  { %38 = vmatpush.msra.mxu0 %v19_v0  ;;  %v16_v3 = vld [vmem:[%s94_s1] sm:$0xff] }
   0x3   :  { %v15_v4 = vld [vmem:[%s95_s0] sm:$0xff] }
   0x4   :  { %39 = vmatpush.msra.mxu0 %v18_v1 }
   0x6   :  { %40 = vmatpush.msra.mxu0 %v17_v2 }
   0x8   :  { %41 = vmatpush.msra.mxu0 %v16_v3 }
   0x9   :  { %52 = vmatmul.msk.f32.vlgmr.msra.gmra.mxu0 %vm22_vm0, %v15_v4 }
  0x86   :  { %v43_v6 = vpop.f32.mrf.mxu0 }
  0x87   :  { %v44_v7 = vadd.f32 %v43_v6, %v21_v5 }
  0x89   :  { %47 = vst.msk [vmem:[%s97_s3] sm:$0xff] %vm46_vm1, %v44_v7 }

</bundles_post_ra>
